<compile_context>
chip_gen: v7x
topology: tpu7x:2x2x1
jax: 0.10.0
libtpu: 0.0.40
codegen_flags: <defaults>
</compile_context>

<pallas_src>
import functools

import numpy as np

import jax
import jax.numpy as jnp
from jax.experimental import pallas as pl
from jax.experimental.pallas import tpu as pltpu


def _residual_block_kernel(x_ref, wc_ref, mask_ref, out_ref, xbuf, hbuf,
                           *, N, C, H, W, K, PADF, act):
    NC, HW = N * C, H * W
    KW = K * K * NC                                  # matmul contraction length

    masks = mask_ref[...]                            # (K, HW) per-dx border masks
    w1 = wc_ref[0:NC, 0:KW]                          # (NC, KW)
    b1 = wc_ref[0:NC, KW:KW + 1]                     # (NC, 1)
    w2 = wc_ref[NC:2 * NC, 0:KW]
    b2 = wc_ref[NC:2 * NC, KW:KW + 1]

    def stage(buf, center):
        # Zero only the two lane-aligned 128-wide halos (covers max shift
        # (K//2)*(W+1)), then one aligned store of the data into the centre.
        buf[:, 0:PADF] = jnp.zeros((NC, PADF), jnp.float32)
        buf[:, PADF + HW:2 * PADF + HW] = jnp.zeros((NC, PADF), jnp.float32)
        buf[:, PADF:PADF + HW] = center

    def conv(buf, wmat, bias):
        # im2col: one lane-shifted (NC, HW) slab per spatial tap (9 total);
        # w-edge taps are masked where the flat shift crossed an image row.
        # The channel/sample mixing is in the block-diagonal weight matrix,
        # so the whole conv is a single MXU matmul.
        slabs = []
        for dy in range(K):
            for dx in range(K):
                s = (dy - K // 2) * W + (dx - K // 2)
                slab = buf[:, PADF + s:PADF + s + HW]        # (NC, HW)
                if dx != K // 2:
                    slab = slab * masks[dx:dx + 1, :]
                slabs.append(slab)
        patches = jnp.concatenate(slabs, axis=0)             # (K*K*NC, HW)
        return jnp.dot(wmat, patches,
                       preferred_element_type=jnp.float32) + bias

    # ---- stage x into the zero-haloed aligned buffer ----
    x = x_ref[...].astype(jnp.float32)
    stage(xbuf, x)

    # ---- conv1 + bias + activation ----
    h = conv(xbuf, w1, b1)
    if act == 'relu':
        h = jnp.maximum(h, 0.0)
    else:                                            # leaky_relu(0.1)
        h = jnp.where(h > 0.0, h, 0.1 * h)

    # ---- stage hidden (aligned) for conv2's shifted reads ----
    stage(hbuf, h)

    # ---- conv2 + bias + residual add ----
    out_ref[...] = (conv(hbuf, w2, b2) + x).astype(out_ref.dtype)


def _make_weight_matrix(w, N, C, K):
    """OIHW conv weights -> (N*C, K*K*N*C) block matrix for the im2col matmul.

    Column block `tap = dy*K + dx` holds a per-sample block-diagonal copy of
    w[:, :, dy, dx]:  entry [n*C + co, tap*N*C + n*C + ci] = w[co, ci, dy, dx],
    zero across samples.  Matches the tap-major, (n, ci)-row ordering of the
    in-kernel patches, so one matmul performs the full conv contraction.
    """
    eye = jnp.eye(N, dtype=jnp.float32)
    blocks = [jnp.kron(eye, w[:, :, dy, dx].astype(jnp.float32))
              for dy in range(K) for dx in range(K)]
    return jnp.concatenate(blocks, axis=1)


def residual_block_nchw(x, w1, b1, w2, b2, *, kernel_size=3, act='relu'):
    """x: (N, C, H, W) f32; w*: (C, C, K, K) OIHW; b*: (C,).
    ResidualBlock defaults: stride=1, padding=K//2, dilation=1."""
    N, C, H, W = x.shape
    K = kernel_size
    NC, HW = N * C, H * W
    PADF = 128                                  # lane-aligned halo
    assert PADF >= (K // 2) * (W + 1), "halo must cover the max flat shift"

    # lane-dense flat layout: rows = (sample, channel) planes, cols = spatial
    x_flat = x.reshape(NC, HW)

    # Pack both convs' weights + biases into ONE constant operand (1 DMA):
    # rows 0:NC -> [W1 | b1], rows NC:2NC -> [W2 | b2].
    wm1 = _make_weight_matrix(w1, N, C, K)                       # (NC, K*K*NC)
    wm2 = _make_weight_matrix(w2, N, C, K)
    bv1 = jnp.tile(b1.reshape(-1), N).reshape(NC, 1).astype(jnp.float32)
    bv2 = jnp.tile(b2.reshape(-1), N).reshape(NC, 1).astype(jnp.float32)
    wconst = jnp.concatenate(
        [jnp.concatenate([wm1, bv1], axis=1),
         jnp.concatenate([wm2, bv2], axis=1)], axis=0)           # (2NC, K*K*NC+1)

    # per-dx border masks over the flattened spatial axis (1 DMA)
    w_pos = np.arange(HW) % W
    masks = jnp.asarray(np.stack(
        [((w_pos + dx - K // 2 >= 0) & (w_pos + dx - K // 2 < W))
         .astype(np.float32) for dx in range(K)]))               # (K, HW)

    kernel = functools.partial(_residual_block_kernel,
                               N=N, C=C, H=H, W=W, K=K, PADF=PADF, act=act)

    out_flat = pl.pallas_call(
        kernel,
        out_shape=jax.ShapeDtypeStruct((NC, HW), x.dtype),
        grid=(1,),
        in_specs=[
            pl.BlockSpec((NC, HW), lambda i: (0, 0)),
            pl.BlockSpec(wconst.shape, lambda i: (0, 0)),
            pl.BlockSpec(masks.shape, lambda i: (0, 0)),
        ],
        out_specs=pl.BlockSpec((NC, HW), lambda i: (0, 0)),
        scratch_shapes=[
            pltpu.VMEM((NC, HW + 2 * PADF), jnp.float32),   # zero-haloed x
            pltpu.VMEM((NC, HW + 2 * PADF), jnp.float32),   # zero-haloed hidden
        ],
        compiler_params=pltpu.CompilerParams(
            dimension_semantics=("arbitrary",)),
    )(x_flat, wconst, masks)

    return out_flat.reshape(N, C, H, W)


def _reference_nchw(x, w1, b1, w2, b2, act='relu'):
    dn = ('NCHW', 'OIHW', 'NCHW')
    h = jax.lax.conv_general_dilated(x, w1, (1, 1), 'SAME',
                                     dimension_numbers=dn)
    h = h + b1.reshape(1, -1, 1, 1)
    h = jnp.maximum(h, 0.0) if act == 'relu' else jnp.where(h > 0, h, 0.1 * h)
    o = jax.lax.conv_general_dilated(h, w2, (1, 1), 'SAME',
                                     dimension_numbers=dn)
    return o + b2.reshape(1, -1, 1, 1) + x


if __name__ == "__main__":
    # ResidualBlock(nf=4, kernel_size=3, stride=1, padding=1, dilation=1, act='relu')
    N, C, H, W = 2, 4, 16, 16
    K = 3

    key = jax.random.PRNGKey(0)
    kx, kw1, kb1, kw2, kb2 = jax.random.split(key, 5)

    # Deterministic init, matching PyTorch Conv2d default bound 1/sqrt(fan_in)
    fan_in = C * K * K
    bound = 1.0 / (fan_in ** 0.5)
    x = jax.random.normal(kx, (N, C, H, W), dtype=jnp.float32)
    w1 = jax.random.uniform(kw1, (C, C, K, K), jnp.float32, -bound, bound)
    b1 = jax.random.uniform(kb1, (C,), jnp.float32, -bound, bound)
    w2 = jax.random.uniform(kw2, (C, C, K, K), jnp.float32, -bound, bound)
    b2 = jax.random.uniform(kb2, (C,), jnp.float32, -bound, bound)

    out = jax.jit(residual_block_nchw)(x, w1, b1, w2, b2)
    out = jax.block_until_ready(out)

    ref = _reference_nchw(x, w1, b1, w2, b2)
    assert out.shape == x.shape
    assert jnp.max(jnp.abs(out - ref)) < 1e-4

    print("KERNEL_OK")
</pallas_src>

<mosaic_0001>
module attributes {stable_mosaic.version = 11 : i64} {
  func.func @_residual_block_kernel(%arg0: i32, %arg1: memref<8x256xf32, #tpu.memory_space<vmem>>, %arg2: memref<16x73xf32, #tpu.memory_space<vmem>>, %arg3: memref<3x256xf32, #tpu.memory_space<vmem>>, %arg4: memref<8x256xf32, #tpu.memory_space<vmem>>, %arg5: memref<8x512xf32, #tpu.memory_space<vmem>>, %arg6: memref<8x512xf32, #tpu.memory_space<vmem>>) attributes {dimension_semantics = [#tpu.dimension_semantics<arbitrary>], iteration_bounds = array<i64: 1>, scalar_prefetch = 0 : i64, scratch_operands = 2 : i64, tpu.core_type = #tpu.core_type<tc>, window_params = [{pipeline_mode = #tpu.pipeline_mode<synchronous>, transform_indices = @transform_0, window_bounds = array<i64: 8, 256>}, {pipeline_mode = #tpu.pipeline_mode<synchronous>, transform_indices = @transform_1, window_bounds = array<i64: 16, 73>}, {pipeline_mode = #tpu.pipeline_mode<synchronous>, transform_indices = @transform_2, window_bounds = array<i64: 3, 256>}, {pipeline_mode = #tpu.pipeline_mode<synchronous>, transform_indices = @transform_3, window_bounds = array<i64: 8, 256>}]} {
    %c0 = arith.constant 0 : index
    %c0_0 = arith.constant 0 : index
    %0 = vector.load %arg3[%c0, %c0_0] : memref<3x256xf32, #tpu.memory_space<vmem>>, vector<3x256xf32>
    %c0_1 = arith.constant 0 : index
    %c0_2 = arith.constant 0 : index
    %1 = vector.load %arg2[%c0_1, %c0_2] : memref<16x73xf32, #tpu.memory_space<vmem>>, vector<8x72xf32>
    %c0_3 = arith.constant 0 : index
    %c72 = arith.constant 72 : index
    %2 = vector.load %arg2[%c0_3, %c72] : memref<16x73xf32, #tpu.memory_space<vmem>>, vector<8x1xf32>
    %c8 = arith.constant 8 : index
    %c0_4 = arith.constant 0 : index
    %3 = vector.load %arg2[%c8, %c0_4] : memref<16x73xf32, #tpu.memory_space<vmem>>, vector<8x72xf32>
    %c8_5 = arith.constant 8 : index
    %c72_6 = arith.constant 72 : index
    %4 = vector.load %arg2[%c8_5, %c72_6] : memref<16x73xf32, #tpu.memory_space<vmem>>, vector<8x1xf32>
    %c0_7 = arith.constant 0 : index
    %c0_8 = arith.constant 0 : index
    %5 = vector.load %arg1[%c0_7, %c0_8] : memref<8x256xf32, #tpu.memory_space<vmem>>, vector<8x256xf32>
    %cst = arith.constant 0.000000e+00 : f32
    %6 = vector.broadcast %cst : f32 to vector<8x128xf32>
    %c0_9 = arith.constant 0 : index
    %c0_10 = arith.constant 0 : index
    %7 = vector.load %arg5[%c0_9, %c0_10] : memref<8x512xf32, #tpu.memory_space<vmem>>, vector<8x128xf32>
    tpu.vector_store %arg5[%c0_9, %c0_10], %6 {strides = array<i32>} : memref<8x512xf32, #tpu.memory_space<vmem>>, vector<8x128xf32>,
    %cst_11 = arith.constant 0.000000e+00 : f32
    %8 = vector.broadcast %cst_11 : f32 to vector<8x128xf32>
    %c0_12 = arith.constant 0 : index
    %c384 = arith.constant 384 : index
    %9 = vector.load %arg5[%c0_12, %c384] : memref<8x512xf32, #tpu.memory_space<vmem>>, vector<8x128xf32>
    tpu.vector_store %arg5[%c0_12, %c384], %8 {strides = array<i32>} : memref<8x512xf32, #tpu.memory_space<vmem>>, vector<8x128xf32>,
    %c0_13 = arith.constant 0 : index
    %c128 = arith.constant 128 : index
    %10 = vector.load %arg5[%c0_13, %c128] : memref<8x512xf32, #tpu.memory_space<vmem>>, vector<8x256xf32>
    tpu.vector_store %arg5[%c0_13, %c128], %5 {strides = array<i32>} : memref<8x512xf32, #tpu.memory_space<vmem>>, vector<8x256xf32>,
    %c0_14 = arith.constant 0 : index
    %c111 = arith.constant 111 : index
    %11 = vector.load %arg5[%c0_14, %c111] : memref<8x512xf32, #tpu.memory_space<vmem>>, vector<8x256xf32>
    %12 = vector.extract_strided_slice %0 {offsets = [0, 0], sizes = [1, 256], strides = [1, 1]} : vector<3x256xf32> to vector<1x256xf32>
    %13 = vector.broadcast %12 : vector<1x256xf32> to vector<8x256xf32>
    %14 = arith.mulf %11, %13 : vector<8x256xf32>
    %c0_15 = arith.constant 0 : index
    %c112 = arith.constant 112 : index
    %15 = vector.load %arg5[%c0_15, %c112] : memref<8x512xf32, #tpu.memory_space<vmem>>, vector<8x256xf32>
    %c0_16 = arith.constant 0 : index
    %c113 = arith.constant 113 : index
    %16 = vector.load %arg5[%c0_16, %c113] : memref<8x512xf32, #tpu.memory_space<vmem>>, vector<8x256xf32>
    %17 = vector.extract_strided_slice %0 {offsets = [2, 0], sizes = [1, 256], strides = [1, 1]} : vector<3x256xf32> to vector<1x256xf32>
    %18 = vector.broadcast %17 : vector<1x256xf32> to vector<8x256xf32>
    %19 = arith.mulf %16, %18 : vector<8x256xf32>
    %c0_17 = arith.constant 0 : index
    %c127 = arith.constant 127 : index
    %20 = vector.load %arg5[%c0_17, %c127] : memref<8x512xf32, #tpu.memory_space<vmem>>, vector<8x256xf32>
    %21 = vector.extract_strided_slice %0 {offsets = [0, 0], sizes = [1, 256], strides = [1, 1]} : vector<3x256xf32> to vector<1x256xf32>
    %22 = vector.broadcast %21 : vector<1x256xf32> to vector<8x256xf32>
    %23 = arith.mulf %20, %22 : vector<8x256xf32>
    %c0_18 = arith.constant 0 : index
    %c128_19 = arith.constant 128 : index
    %24 = vector.load %arg5[%c0_18, %c128_19] : memref<8x512xf32, #tpu.memory_space<vmem>>, vector<8x256xf32>
    %c0_20 = arith.constant 0 : index
    %c129 = arith.constant 129 : index
    %25 = vector.load %arg5[%c0_20, %c129] : memref<8x512xf32, #tpu.memory_space<vmem>>, vector<8x256xf32>
    %26 = vector.extract_strided_slice %0 {offsets = [2, 0], sizes = [1, 256], strides = [1, 1]} : vector<3x256xf32> to vector<1x256xf32>
    %27 = vector.broadcast %26 : vector<1x256xf32> to vector<8x256xf32>
    %28 = arith.mulf %25, %27 : vector<8x256xf32>
    %c0_21 = arith.constant 0 : index
    %c143 = arith.constant 143 : index
    %29 = vector.load %arg5[%c0_21, %c143] : memref<8x512xf32, #tpu.memory_space<vmem>>, vector<8x256xf32>
    %30 = vector.extract_strided_slice %0 {offsets = [0, 0], sizes = [1, 256], strides = [1, 1]} : vector<3x256xf32> to vector<1x256xf32>
    %31 = vector.broadcast %30 : vector<1x256xf32> to vector<8x256xf32>
    %32 = arith.mulf %29, %31 : vector<8x256xf32>
    %c0_22 = arith.constant 0 : index
    %c144 = arith.constant 144 : index
    %33 = vector.load %arg5[%c0_22, %c144] : memref<8x512xf32, #tpu.memory_space<vmem>>, vector<8x256xf32>
    %c0_23 = arith.constant 0 : index
    %c145 = arith.constant 145 : index
    %34 = vector.load %arg5[%c0_23, %c145] : memref<8x512xf32, #tpu.memory_space<vmem>>, vector<8x256xf32>
    %35 = vector.extract_strided_slice %0 {offsets = [2, 0], sizes = [1, 256], strides = [1, 1]} : vector<3x256xf32> to vector<1x256xf32>
    %36 = vector.broadcast %35 : vector<1x256xf32> to vector<8x256xf32>
    %37 = arith.mulf %34, %36 : vector<8x256xf32>
    %38 = tpu.concatenate %14, %15, %19, %23, %24, %28, %32, %33, %37 in 0 : vector<8x256xf32>, vector<8x256xf32>, vector<8x256xf32>, vector<8x256xf32>, vector<8x256xf32>, vector<8x256xf32>, vector<8x256xf32>, vector<8x256xf32>, vector<8x256xf32> -> vector<72x256xf32>
    %cst_24 = arith.constant dense<0.000000e+00> : vector<8x256xf32>
    %39 = tpu.matmul %1, %38, %cst_24 {dimension_numbers = #tpu.dot_dimension_numbers<[1], [0], [0], [1], [0, 0, 1, 1], [], []>} : vector<8x72xf32>, vector<72x256xf32>, vector<8x256xf32> -> vector<8x256xf32>
    %40 = vector.broadcast %2 : vector<8x1xf32> to vector<8x256xf32>
    %41 = arith.addf %39, %40 : vector<8x256xf32>
    %cst_25 = arith.constant 0.000000e+00 : f32
    %42 = vector.broadcast %cst_25 : f32 to vector<8x256xf32>
    %43 = arith.maximumf %41, %42 : vector<8x256xf32>
    %cst_26 = arith.constant 0.000000e+00 : f32
    %44 = vector.broadcast %cst_26 : f32 to vector<8x128xf32>
    %c0_27 = arith.constant 0 : index
    %c0_28 = arith.constant 0 : index
    %45 = vector.load %arg6[%c0_27, %c0_28] : memref<8x512xf32, #tpu.memory_space<vmem>>, vector<8x128xf32>
    tpu.vector_store %arg6[%c0_27, %c0_28], %44 {strides = array<i32>} : memref<8x512xf32, #tpu.memory_space<vmem>>, vector<8x128xf32>,
    %cst_29 = arith.constant 0.000000e+00 : f32
    %46 = vector.broadcast %cst_29 : f32 to vector<8x128xf32>
    %c0_30 = arith.constant 0 : index
    %c384_31 = arith.constant 384 : index
    %47 = vector.load %arg6[%c0_30, %c384_31] : memref<8x512xf32, #tpu.memory_space<vmem>>, vector<8x128xf32>
    tpu.vector_store %arg6[%c0_30, %c384_31], %46 {strides = array<i32>} : memref<8x512xf32, #tpu.memory_space<vmem>>, vector<8x128xf32>,
    %c0_32 = arith.constant 0 : index
    %c128_33 = arith.constant 128 : index
    %48 = vector.load %arg6[%c0_32, %c128_33] : memref<8x512xf32, #tpu.memory_space<vmem>>, vector<8x256xf32>
    tpu.vector_store %arg6[%c0_32, %c128_33], %43 {strides = array<i32>} : memref<8x512xf32, #tpu.memory_space<vmem>>, vector<8x256xf32>,
    %c0_34 = arith.constant 0 : index
    %c111_35 = arith.constant 111 : index
    %49 = vector.load %arg6[%c0_34, %c111_35] : memref<8x512xf32, #tpu.memory_space<vmem>>, vector<8x256xf32>
    %50 = vector.extract_strided_slice %0 {offsets = [0, 0], sizes = [1, 256], strides = [1, 1]} : vector<3x256xf32> to vector<1x256xf32>
    %51 = vector.broadcast %50 : vector<1x256xf32> to vector<8x256xf32>
    %52 = arith.mulf %49, %51 : vector<8x256xf32>
    %c0_36 = arith.constant 0 : index
    %c112_37 = arith.constant 112 : index
    %53 = vector.load %arg6[%c0_36, %c112_37] : memref<8x512xf32, #tpu.memory_space<vmem>>, vector<8x256xf32>
    %c0_38 = arith.constant 0 : index
    %c113_39 = arith.constant 113 : index
    %54 = vector.load %arg6[%c0_38, %c113_39] : memref<8x512xf32, #tpu.memory_space<vmem>>, vector<8x256xf32>
    %55 = vector.extract_strided_slice %0 {offsets = [2, 0], sizes = [1, 256], strides = [1, 1]} : vector<3x256xf32> to vector<1x256xf32>
    %56 = vector.broadcast %55 : vector<1x256xf32> to vector<8x256xf32>
    %57 = arith.mulf %54, %56 : vector<8x256xf32>
    %c0_40 = arith.constant 0 : index
    %c127_41 = arith.constant 127 : index
    %58 = vector.load %arg6[%c0_40, %c127_41] : memref<8x512xf32, #tpu.memory_space<vmem>>, vector<8x256xf32>
    %59 = vector.extract_strided_slice %0 {offsets = [0, 0], sizes = [1, 256], strides = [1, 1]} : vector<3x256xf32> to vector<1x256xf32>
    %60 = vector.broadcast %59 : vector<1x256xf32> to vector<8x256xf32>
    %61 = arith.mulf %58, %60 : vector<8x256xf32>
    %c0_42 = arith.constant 0 : index
    %c128_43 = arith.constant 128 : index
    %62 = vector.load %arg6[%c0_42, %c128_43] : memref<8x512xf32, #tpu.memory_space<vmem>>, vector<8x256xf32>
    %c0_44 = arith.constant 0 : index
    %c129_45 = arith.constant 129 : index
    %63 = vector.load %arg6[%c0_44, %c129_45] : memref<8x512xf32, #tpu.memory_space<vmem>>, vector<8x256xf32>
    %64 = vector.extract_strided_slice %0 {offsets = [2, 0], sizes = [1, 256], strides = [1, 1]} : vector<3x256xf32> to vector<1x256xf32>
    %65 = vector.broadcast %64 : vector<1x256xf32> to vector<8x256xf32>
    %66 = arith.mulf %63, %65 : vector<8x256xf32>
    %c0_46 = arith.constant 0 : index
    %c143_47 = arith.constant 143 : index
    %67 = vector.load %arg6[%c0_46, %c143_47] : memref<8x512xf32, #tpu.memory_space<vmem>>, vector<8x256xf32>
    %68 = vector.extract_strided_slice %0 {offsets = [0, 0], sizes = [1, 256], strides = [1, 1]} : vector<3x256xf32> to vector<1x256xf32>
    %69 = vector.broadcast %68 : vector<1x256xf32> to vector<8x256xf32>
    %70 = arith.mulf %67, %69 : vector<8x256xf32>
    %c0_48 = arith.constant 0 : index
    %c144_49 = arith.constant 144 : index
    %71 = vector.load %arg6[%c0_48, %c144_49] : memref<8x512xf32, #tpu.memory_space<vmem>>, vector<8x256xf32>
    %c0_50 = arith.constant 0 : index
    %c145_51 = arith.constant 145 : index
    %72 = vector.load %arg6[%c0_50, %c145_51] : memref<8x512xf32, #tpu.memory_space<vmem>>, vector<8x256xf32>
    %73 = vector.extract_strided_slice %0 {offsets = [2, 0], sizes = [1, 256], strides = [1, 1]} : vector<3x256xf32> to vector<1x256xf32>
    %74 = vector.broadcast %73 : vector<1x256xf32> to vector<8x256xf32>
    %75 = arith.mulf %72, %74 : vector<8x256xf32>
    %76 = tpu.concatenate %52, %53, %57, %61, %62, %66, %70, %71, %75 in 0 : vector<8x256xf32>, vector<8x256xf32>, vector<8x256xf32>, vector<8x256xf32>, vector<8x256xf32>, vector<8x256xf32>, vector<8x256xf32>, vector<8x256xf32>, vector<8x256xf32> -> vector<72x256xf32>
    %cst_52 = arith.constant dense<0.000000e+00> : vector<8x256xf32>
    %77 = tpu.matmul %3, %76, %cst_52 {dimension_numbers = #tpu.dot_dimension_numbers<[1], [0], [0], [1], [0, 0, 1, 1], [], []>} : vector<8x72xf32>, vector<72x256xf32>, vector<8x256xf32> -> vector<8x256xf32>
    %78 = vector.broadcast %4 : vector<8x1xf32> to vector<8x256xf32>
    %79 = arith.addf %77, %78 : vector<8x256xf32>
    %80 = arith.addf %79, %5 : vector<8x256xf32>
    %c0_53 = arith.constant 0 : index
    %c0_54 = arith.constant 0 : index
    %81 = vector.load %arg4[%c0_53, %c0_54] : memref<8x256xf32, #tpu.memory_space<vmem>>, vector<8x256xf32>
    tpu.vector_store %arg4[%c0_53, %c0_54], %80 {strides = array<i32>} : memref<8x256xf32, #tpu.memory_space<vmem>>, vector<8x256xf32>,
    return
  }
  func.func @transform_0(%arg0: i32) -> (i32, i32) {
    %c0_i32 = arith.constant 0 : i32
    %c0_i32_0 = arith.constant 0 : i32
    %c0_i32_1 = arith.constant 0 : i32
    return %c0_i32, %c0_i32_0 : i32, i32
  }
  func.func @transform_1(%arg0: i32) -> (i32, i32) {
    %c0_i32 = arith.constant 0 : i32
    %c0_i32_0 = arith.constant 0 : i32
    %c0_i32_1 = arith.constant 0 : i32
    return %c0_i32, %c0_i32_0 : i32, i32
  }
  func.func @transform_2(%arg0: i32) -> (i32, i32) {
    %c0_i32 = arith.constant 0 : i32
    %c0_i32_0 = arith.constant 0 : i32
    %c0_i32_1 = arith.constant 0 : i32
    return %c0_i32, %c0_i32_0 : i32, i32
  }
  func.func @transform_3(%arg0: i32) -> (i32, i32) {
    %c0_i32 = arith.constant 0 : i32
    %c0_i32_0 = arith.constant 0 : i32
    %c0_i32_1 = arith.constant 0 : i32
    return %c0_i32, %c0_i32_0 : i32, i32
  }
}

</mosaic_0001>

<bundles_post_ra>
// kernel: tile.13
= control target key start
LH: loop header
LB: loop body
LE: loop exit
PB: predicated region body
PF: predicated region fallthrough
CT: control target
= control target key end

     0   :  { %s22_s0 = inlined_call_operand.vmem [shape: f32[4], index: 0, kind: input, shape index: {}]   ;;  %s23_s1 = inlined_call_operand.vmem [shape: f32[2,4], index: 1, kind: output, shape index: {}]  }
   0x1   :  { %v4_v0 = vld [vmem:[%s22_s0] ss:$0 sm:$0xff] }
   0x2   :  { %5 = vst [vmem:[%s23_s1] sm:$0x3] %v4_v0 }

// kernel: tile.0
= control target key start
LH: loop header
LB: loop body
LE: loop exit
PB: predicated region body
PF: predicated region fallthrough
CT: control target
= control target key end

     0   :  { %s34_s8 = smov 125   ;;  %vm7_vm0 = vcmask 7168   ;;  %s35_s11 = smov 126   ;;  %s61_s0 = inlined_call_operand.vmem [shape: f32[2,4], index: 0, kind: input, shape index: {}]   ;;  %s62_s1 = inlined_call_operand.vmem [shape: f32[8,1], index: 1, kind: output, shape index: {}]  }
   0x1   :  { %v4_v0 = vld [vmem:[%s61_s0] sm:$0x3]  ;;  %s33_s0 = smov 127  }
   0x2   :  { %5 = vst [vmem:[#allocation0] sm:$0x3] %v4_v0 }
   0x9   :  { %v9_v1 = vld [vmem:[#allocation0] sm:$0x3]  }
   0xa   :  { %v21_v2 = vld [vmem:[#allocation0] sm:$0x3]   ;;  %10 = vrot.lane.b32.xlu0 %v9_v1, %s33_s0 }
   0xb   :  { %22 = vrot.lane.b32.xlu1 %v21_v2, %s34_s8  ;;  %v6_v3 = vld [vmem:[#allocation0] sm:$0x3]  }
   0xc   :  { %v15_v4 = vld [vmem:[#allocation0] sm:$0x3]   ;;  %8 = vst.msk [vmem:[%s62_s1] ss:$4 sm:$0x3] %vm7_vm0, %v6_v3  }
   0xe   :  { %16 = vrot.lane.b32.xlu0 %v15_v4, %s35_s11 }
  0x7c   :  { %v11_v5 = vpop.permute.xlu0 %10  }
  0x7d   :  { %v23_v6 = vpop.permute.xlu1 %22   ;;  %27 = vst.msk [vmem:[%s62_s1 + $0x1] ss:$4 sm:$0x3] %vm7_vm0, %v11_v5  }
  0x7e   :  { %29 = vst.msk [vmem:[%s62_s1 + $0x3] ss:$4 sm:$0x3] %vm7_vm0, %v23_v6  }
  0x80   :  { %v17_v7 = vpop.permute.xlu0 %16  }
  0x81   :  { %28 = vst.msk [vmem:[%s62_s1 + $0x2] ss:$4 sm:$0x3] %vm7_vm0, %v17_v7  }

// kernel: residual_block_nchw.1
= control target key start
LH: loop header
LB: loop body
LE: loop exit
PB: predicated region body
PF: predicated region fallthrough
CT: control target
= control target key end

     0   :  { %v27_v0 = vlaneseq  ;;  %v933_v1 = vmov 0.0   ;;  %s934_s14 = smov 113   ;;  %s935_s15 = smov 127   ;;  %vm95_vm0 = vcmask 1039360   ;;  %vm83_vm1 = vcmask 924672   ;;  %s1239_s2 = inlined_call_operand.vmem [shape: f32[3,256], index: 2, kind: input, shape index: {}]   ;;  %s1240_s0 = inlined_call_operand.vmem [shape: f32[8,256], index: 0, kind: input, shape index: {}]   ;;  %s1241_s1 = inlined_call_operand.vmem [shape: f32[16,73], index: 1, kind: input, shape index: {}]   ;;  %s1242_s3 = inlined_call_operand.vmem [shape: f32[8,256], index: 3, kind: output, shape index: {}]  }
   0x1   :  { %395 = vmatprep.mubr.f32.mxu0 %v933_v1  ;;  %678 = vmatprep.mubr.f32.mxu1 %v933_v1  ;;  %v14_v3 = vld [vmem:[%s1239_s2] sm:$0x77]  ;;  %s936_s2 = smov 1   ;;  %s937_s16 = smov 15   ;;  %v984_v17 = vld [vmem:[%s1240_s0 + $0x8] sm:$0xff]  ;;  %vm110_vm2 = vcmask 7168  }
   0x2   :  { %v28_v2 = vshrl.u32 %v27_v0, 7  ;;  %s938_s17 = smov 17   ;;  %v979_v16 = vld [vmem:[%s1240_s0] sm:$0xff]  ;;  %s939_s22 = smov 111   ;;  %vm122_vm3 = vcmask 121856   ;;  %vm134_vm4 = vcmask 138240  }
   0x3   :  { %v741_v18 = vpack.i.bf16 %v984_v17, %v979_v16  ;;  %s940_s0 = smov 112   ;;  %s941_s23 = smov 126   ;;  %vm51_vm5 = vcmask 908288   ;;  %vm174_vm6 = vcmask 916480   ;;  %vm162_vm7 = vcmask 1031168  }
   0x4   :  { %v61_v4 = vsub.s32 2, %v28_v2  ;;  %v29_v5 = vsub.s32 0, %v28_v2  ;;  %v65_v6 = vsub.s32 6, %v28_v2  ;;  %v33_v7 = vsub.s32 4, %v28_v2  ;;  %s942_s24 = smov 95   ;;  %s943_s25 = smov 110  }
   0x5   :  { %s944_s26 = smov 96   ;;  %s945_s27 = smov 94   ;;  %vm215_vm8 = vcmask 777216   ;;  %vm191_vm9 = vcmask 900096   ;;  %vm203_vm10 = vcmask 785408   ;;  %vm227_vm11 = vcmask 769024  }
   0x6   :  { %v62_v8 = vrot.slane %v14_v3, %v61_v4  ;;  %v30_v9 = vrot.slane %v14_v3, %v29_v5  ;;  %v66_v10 = vrot.slane %v14_v3, %v65_v6  ;;  %v34_v11 = vrot.slane %v14_v3, %v33_v7 }
   0x7   :  { %vm328_vm12 = vcmask 588800  }
   0x8   :  { %v72_v12 = vrot.slane %v62_v8, %v61_v4  ;;  %v40_v13 = vrot.slane %v30_v9, %v29_v5  ;;  %v76_v14 = vrot.slane %v66_v10, %v61_v4  ;;  %v44_v15 = vrot.slane %v34_v11, %v29_v5 }
   0x9   :  { %v946_v5 = vmov 72  }
   0xa   :  { %79 = vrot.lane.b32.xlu0 %v72_v12, %s934_s14  ;;  %91 = vrot.lane.b32.xlu1 %v40_v13, %s935_s15 }
   0xb   :  { %836 = vset.pattern.permute.xlu1 %v946_v5  ;;  %932 = vset.pattern.permute.xlu0 %v946_v5 }
   0xe   :  { %81 = vrot.lane.b32.xlu0 %v76_v14, %s934_s14  ;;  %93 = vrot.lane.b32.xlu1 %v44_v15, %s935_s15 }
  0x12   :  { %106 = vrot.lane.b32.xlu0 %v72_v12, %s936_s2  ;;  %108 = vrot.lane.b32.xlu1 %v76_v14, %s936_s2 }
  0x16   :  { %118 = vrot.lane.b32.xlu0 %v40_v13, %s937_s16  ;;  %120 = vrot.lane.b32.xlu1 %v44_v15, %s937_s16 }
  0x1a   :  { %130 = vrot.lane.b32.xlu0 %v72_v12, %s938_s17  ;;  %132 = vrot.lane.b32.xlu1 %v76_v14, %s938_s17 }
  0x1e   :  { %47 = vrot.lane.b32.xlu0 %v40_v13, %s939_s22  ;;  %49 = vrot.lane.b32.xlu1 %v44_v15, %s939_s22 }
  0x22   :  { %742 = vrot.lane.b32.xlu0 %v741_v18, %s935_s15  ;;  %145 = vrot.lane.b32.xlu1 %v933_v1, %s935_s15 }
  0x26   :  { %747 = vrot.lane.b32.xlu0 %v741_v18, %s939_s22 }
  0x7c   :  { %v80_v19 = vpop.permute.xlu0 %79  ;;  %v92_v20 = vpop.permute.xlu1 %91 }
  0x7d   :  { %v994_v21 = vmul.f32 0.0, %v80_v19  ;;  %v996_v22 = vmul.f32 0.0, %v92_v20 }
  0x7f   :  { %168 = vrot.lane.b32.xlu1 %v996_v22, %s940_s0  ;;  %156 = vrot.lane.b32.xlu0 %v994_v21, %s941_s23 }
  0x80   :  { %v1002_v23 = vpop.permute.xlu0 %81  ;;  %v1004_v24 = vpop.permute.xlu1 %93 }
  0x81   :  { %v1008_v25 = vsel %vm95_vm0, %v92_v20, %v1004_v24  ;;  %v102_v26 = vmul.f32 %v1004_v24, %v984_v17  ;;  %v1013_v27 = vsel %vm83_vm1, %v80_v19, %v1002_v23  ;;  %v90_v29 = vmul.f32 %v1002_v23, %v984_v17 }
  0x82   :  { %v101_v28 = vmul.f32 %v1008_v25, %v979_v16  ;;  %v89_v33 = vmul.f32 %v1013_v27, %v979_v16 }
  0x83   :  { %757 = vrot.lane.b32.xlu1 %v741_v18, %s942_s24 }
  0x84   :  { %v1020_v30 = vpop.permute.xlu0 %106  ;;  %v109_v31 = vpop.permute.xlu1 %108  ;;  %v761_v32 = vpack.i.bf16 %v102_v26, %v101_v28  ;;  %v751_v43 = vpack.i.bf16 %v90_v29, %v89_v33 }
  0x85   :  { %v115_v34 = vmul.f32 %v1020_v30, %v979_v16  ;;  %v1027_v35 = vsel %vm110_vm2, %v1020_v30, %v109_v31  ;;  %v1029_v36 = vmul.f32 0.0, %v109_v31 }
  0x86   :  { %v116_v37 = vmul.f32 %v1027_v35, %v984_v17 }
  0x87   :  { %189 = vrot.lane.b32.xlu0 %v1029_v36, %s943_s25  ;;  %762 = vrot.lane.b32.xlu1 %v761_v32, %s940_s0 }
  0x88   :  { %v1036_v38 = vpop.permute.xlu0 %118  ;;  %v121_v39 = vpop.permute.xlu1 %120  ;;  %v766_v40 = vpack.i.bf16 %v116_v37, %v115_v34 }
  0x89   :  { %v127_v41 = vmul.f32 %v1036_v38, %v979_v16  ;;  %v1041_v42 = vsel %vm122_vm3, %v1036_v38, %v121_v39  ;;  %v1045_v45 = vmul.f32 0.0, %v121_v39 }
  0x8a   :  { %v128_v44 = vmul.f32 %v1041_v42, %v984_v17 }
  0x8b   :  { %767 = vrot.lane.b32.xlu1 %v766_v40, %s943_s25  ;;  %752 = vrot.lane.b32.xlu0 %v751_v43, %s941_s23 }
  0x8c   :  { %v771_v46 = vpack.i.bf16 %v128_v44, %v127_v41  ;;  %v1049_v47 = vpop.permute.xlu0 %130  ;;  %v133_v48 = vpop.permute.xlu1 %132 }
  0x8d   :  { %v139_v49 = vmul.f32 %v1049_v47, %v979_v16  ;;  %v1058_v50 = vsel %vm134_vm4, %v1049_v47, %v133_v48  ;;  %v1066_v54 = vmul.f32 0.0, %v133_v48 }
  0x8e   :  { %v140_v53 = vmul.f32 %v1058_v50, %v984_v17 }
  0x8f   :  { %772 = vrot.lane.b32.xlu1 %v771_v46, %s944_s26  ;;  %201 = vrot.lane.b32.xlu0 %v1045_v45, %s944_s26 }
  0x90   :  { %v48_v51 = vpop.permute.xlu0 %47  ;;  %v1060_v52 = vpop.permute.xlu1 %49 }
  0x91   :  { %v1069_v55 = vmul.f32 0.0, %v48_v51  ;;  %v1078_v62 = vsel %vm51_vm5, %v48_v51, %v1060_v52  ;;  %v58_v7 = vmul.f32 %v1060_v52, %v984_v17 }
  0x92   :  { %v57_v6 = vmul.f32 %v1078_v62, %v979_v16 }
  0x93   :  { %213 = vrot.lane.b32.xlu0 %v933_v1, %s942_s24  ;;  %221 = vrot.lane.b32.xlu1 %v139_v49, %s945_s27 }
  0x94   :  { %v743_v56 = vpop.permute.xlu0 %742  ;;  %v146_v57 = vpop.permute.xlu1 %145  ;;  %v791_v10 = vpack.i.bf16 %v58_v7, %v57_v6 }
  0x95   :  { %v745_v58 = vunpack.i.h.bf16 %v743_v56  ;;  %v744_v59 = vunpack.i.l.bf16 %v743_v56 }
  0x97   :  { %223 = vrot.lane.b32.xlu0 %v140_v53, %s945_s27  ;;  %225 = vrot.lane.b32.xlu1 %v1066_v54, %s945_s27  ;;  %v152_v60 = vsel %vm95_vm0, %v744_v59, %v745_v58  ;;  %v151_v61 = vsel %vm95_vm0, %v146_v57, %v744_v59 }
  0x98   :  { %v776_v63 = vpack.i.bf16 %v745_v58, %v152_v60  ;;  %v781_v0 = vpack.i.bf16 %v151_v61, %v1069_v55  ;;  %v748_v2 = vpop.permute.xlu0 %747 }
  0x99   :  { %v750_v3 = vunpack.i.h.bf16 %v748_v2  ;;  %v749_v4 = vunpack.i.l.bf16 %v748_v2 }
  0x9b   :  { %v181_v8 = vsel %vm51_vm5, %v749_v4, %v750_v3  ;;  %782 = vrot.lane.b32.xlu0 %v781_v0, %s938_s17  ;;  %777 = vrot.lane.b32.xlu1 %v776_v63, %s938_s17 }
  0x9c   :  { %v786_v9 = vpack.i.bf16 %v750_v3, %v181_v8 }
  0x9f   :  { %787 = vrot.lane.b32.xlu0 %v786_v9, %s938_s17 }
  0xa3   :  { %792 = vrot.lane.b32.xlu0 %v791_v10, %s938_s17 }
  0xf1   :  { %v169_v11 = vpop.permute.xlu1 %168  ;;  %v157_v12 = vpop.permute.xlu0 %156 }
  0xf5   :  { %v758_v13 = vpop.permute.xlu1 %757 }
  0xf6   :  { %v760_v39 = vunpack.i.h.bf16 %v758_v13  ;;  %v759_v40 = vunpack.i.l.bf16 %v758_v13 }
  0xf8   :  { %v216_v51 = vsel %vm215_vm8, %v759_v40, %v760_v39 }
  0xf9   :  { %v190_v14 = vpop.permute.xlu0 %189  ;;  %v763_v15 = vpop.permute.xlu1 %762 }
  0xfa   :  { %v765_v18 = vunpack.i.h.bf16 %v763_v15  ;;  %v764_v19 = vunpack.i.l.bf16 %v763_v15 }
  0xfc   :  { %v176_v20 = vsel %vm174_vm6, %v764_v19, %v765_v18  ;;  %v175_v49 = vsel %vm174_vm6, %v169_v11, %v764_v19 }
  0xfd   :  { %v801_v26 = vpack.i.bf16 %v765_v18, %v176_v20  ;;  %v768_v28 = vpop.permute.xlu1 %767  ;;  %v753_v29 = vpop.permute.xlu0 %752 }
  0xfe   :  { %v769_v31 = vunpack.i.l.bf16 %v768_v28  ;;  %v755_v32 = vunpack.i.h.bf16 %v753_v29  ;;  %v754_v33 = vunpack.i.l.bf16 %v753_v29  ;;  %v770_v44 = vunpack.i.h.bf16 %v768_v28 }
  0xff   :  { %802 = vrot.lane.b32.xlu0 %v801_v26, %s938_s17 }
 0x100   :  { %v806_v34 = vpack.i.bf16 %v769_v31, %v749_v4  ;;  %v164_v37 = vsel %vm162_vm7, %v754_v33, %v755_v32  ;;  %v163_v46 = vsel %vm162_vm7, %v157_v12, %v754_v33  ;;  %v192_v59 = vsel %vm191_vm9, %v769_v31, %v770_v44 }
 0x101   :  { %v796_v41 = vpack.i.bf16 %v755_v32, %v164_v37  ;;  %v202_v43 = vpop.permute.xlu0 %201  ;;  %v773_v48 = vpop.permute.xlu1 %772  ;;  %v816_v56 = vpack.i.bf16 %v175_v49, %v163_v46  ;;  %v193_v60 = vsel %vm191_vm9, %v770_v44, %v190_v14  ;;  %v1120_v32 = vld [vmem:[%s1241_s1] sm:$0xff] }
 0x102   :  { %v775_v57 = vunpack.i.h.bf16 %v773_v48  ;;  %v774_v0 = vunpack.i.l.bf16 %v773_v48  ;;  %v821_v3 = vpack.i.bf16 %v193_v60, %v192_v59 }
 0x103   :  { %797 = vrot.lane.b32.xlu1 %v796_v41, %s938_s17  ;;  %807 = vrot.lane.b32.xlu0 %v806_v34, %s938_s17 }
 0x104   :  { %v204_v4 = vsel %vm203_vm10, %v774_v0, %v775_v57  ;;  %v205_v5 = vsel %vm203_vm10, %v775_v57, %v202_v43  ;;  %v831_v11 = vpack.i.bf16 %v759_v40, %v774_v0 }
 0x105   :  { %v214_v53 = vpop.permute.xlu0 %213  ;;  %v222_v63 = vpop.permute.xlu1 %221  ;;  %v826_v8 = vpack.i.bf16 %v205_v5, %v204_v4 }
 0x106   :  { %v217_v58 = vsel %vm215_vm8, %v760_v39, %v214_v53 }
 0x107   :  { %v811_v61 = vpack.i.bf16 %v217_v58, %v216_v51  ;;  %817 = vrot.lane.b32.xlu1 %v816_v56, %s938_s17 }
 0x109   :  { %812 = vrot.lane.b32.xlu0 %v811_v61, %s938_s17  ;;  %v224_v2 = vpop.permute.xlu0 %223  ;;  %v226_v7 = vpop.permute.xlu1 %225 }
 0x10a   :  { %v228_v6 = vsel %vm227_vm11, %v222_v63, %v224_v2  ;;  %v229_v18 = vsel %vm227_vm11, %v224_v2, %v226_v7 }
 0x10b   :  { %822 = vrot.lane.b32.xlu1 %v821_v3, %s938_s17 }
 0x10d   :  { %288 = vrot.lane.b32.xlu0 %v228_v6, %s938_s17  ;;  %v783_v9 = vpop.permute.xlu0 %782  ;;  %v778_v10 = vpop.permute.xlu1 %777 }
 0x10e   :  { %v785_v13 = vunpack.i.h.bf16 %v783_v9  ;;  %v780_v14 = vunpack.i.h.bf16 %v778_v10  ;;  %v779_v15 = vunpack.i.l.bf16 %v778_v10  ;;  %v784_v19 = vunpack.i.l.bf16 %v783_v9 }
 0x10f   :  { %827 = vrot.lane.b32.xlu1 %v826_v8, %s938_s17 }
 0x110   :  { %v295_v29 = vsel %vm134_vm4, %v779_v15, %v780_v14  ;;  %v294_v31 = vsel %vm134_vm4, %v785_v13, %v779_v15 }
 0x111   :  { %286 = vrot.lane.b32.xlu0 %v222_v63, %s938_s17  ;;  %v788_v12 = vpop.permute.xlu0 %787 }
 0x112   :  { %v790_v58 = vunpack.i.h.bf16 %v788_v12  ;;  %v789_v59 = vunpack.i.l.bf16 %v788_v12 }
 0x113   :  { %832 = vrot.lane.b32.xlu1 %v831_v11, %s938_s17 }
 0x114   :  { %v301_v6 = vsel %vm134_vm4, %v789_v59, %v790_v58 }
 0x115   :  { %446 = vrot.lane.b32.xlu0 %v994_v21, %s941_s23  ;;  %v793_v20 = vpop.permute.xlu0 %792 }
 0x116   :  { %v795_v26 = vunpack.i.h.bf16 %v793_v20  ;;  %v794_v28 = vunpack.i.l.bf16 %v793_v20 }
 0x117   :  { %290 = vrot.lane.b32.xlu1 %v229_v18, %s938_s17 }
 0x118   :  { %v293_v33 = vsel %vm134_vm4, %v794_v28, %v795_v26  ;;  %v292_v34 = vsel %vm134_vm4, %v784_v19, %v794_v28 }
 0x119   :  { %477 = vrot.lane.b32.xlu0 %v1029_v36, %s943_s25  ;;  %v695_v21 = vpack.c.bf16 %v295_v29, %v293_v33  ;;  %v697_v37 = vpack.c.bf16 %v294_v31, %v292_v34 }
 0x11b   :  { %232 = vperm.xlu1 %836, %v1120_v32   ;;  %696 = vmatprep.subr.bf16.mxu0 %v695_v21 }
 0x11c   :  { %698 = vmatpush1.bf16.msra.mxu0 %v697_v37 }
 0x11f   :  { %435 = vrot.lane.b32.xlu1 %v933_v1, %s935_s15 }
 0x123   :  { %457 = vrot.lane.b32.xlu1 %v996_v22, %s940_s0 }
 0x171   :  { %v803_v39 = vpop.permute.xlu0 %802 }
 0x172   :  { %v805_v40 = vunpack.i.h.bf16 %v803_v39  ;;  %v804_v41 = vunpack.i.l.bf16 %v803_v39 }
 0x174   :  { %v299_v49 = vsel %vm134_vm4, %v804_v41, %v805_v40 }
 0x175   :  { %v798_v43 = vpop.permute.xlu1 %797  ;;  %v808_v48 = vpop.permute.xlu0 %807 }
 0x176   :  { %v800_v44 = vunpack.i.h.bf16 %v798_v43  ;;  %v799_v46 = vunpack.i.l.bf16 %v798_v43  ;;  %v809_v60 = vunpack.i.l.bf16 %v808_v48  ;;  %v810_v3 = vunpack.i.h.bf16 %v808_v48 }
 0x178   :  { %v297_v36 = vsel %vm134_vm4, %v799_v46, %v800_v44  ;;  %v300_v7 = vsel %vm134_vm4, %v809_v60, %v789_v59 }
 0x179   :  { %v818_v51 = vpop.permute.xlu1 %817  ;;  %v699_v53 = vpack.c.bf16 %v299_v49, %v297_v36 }
 0x17a   :  { %v820_v56 = vunpack.i.h.bf16 %v818_v51  ;;  %v819_v57 = vunpack.i.l.bf16 %v818_v51 }
 0x17b   :  { %700 = vmatprep.subr.bf16.mxu0 %v699_v53  ;;  %v813_v63 = vpop.permute.xlu0 %812 }
 0x17c   :  { %v296_v22 = vsel %vm134_vm4, %v819_v57, %v799_v46  ;;  %v298_v61 = vsel %vm134_vm4, %v820_v56, %v804_v41  ;;  %v815_v8 = vunpack.i.h.bf16 %v813_v63  ;;  %v814_v9 = vunpack.i.l.bf16 %v813_v63 }
 0x17d   :  { %v823_v0 = vpop.permute.xlu1 %822  ;;  %v701_v2 = vpack.c.bf16 %v298_v61, %v296_v22 }
 0x17e   :  { %v825_v4 = vunpack.i.h.bf16 %v823_v0  ;;  %v824_v5 = vunpack.i.l.bf16 %v823_v0  ;;  %v307_v20 = vsel %vm134_vm4, %v814_v9, %v815_v8 }
 0x17f   :  { %702 = vmatpush1.bf16.msra.mxu0 %v701_v2  ;;  %v289_v33 = vpop.permute.xlu0 %288 }
 0x180   :  { %v303_v10 = vsel %vm134_vm4, %v824_v5, %v825_v4  ;;  %v302_v11 = vsel %vm134_vm4, %v810_v3, %v824_v5 }
 0x181   :  { %v828_v12 = vpop.permute.xlu1 %827  ;;  %v703_v13 = vpack.c.bf16 %v303_v10, %v301_v6  ;;  %v705_v14 = vpack.c.bf16 %v302_v11, %v300_v7 }
 0x182   :  { %v830_v15 = vunpack.i.h.bf16 %v828_v12  ;;  %v829_v18 = vunpack.i.l.bf16 %v828_v12 }
 0x183   :  { %704 = vmatprep.subr.bf16.mxu0 %v703_v13  ;;  %v287_v41 = vpop.permute.xlu0 %286 }
 0x184   :  { %706 = vmatpush1.bf16.msra.mxu0 %v705_v14  ;;  %v305_v19 = vsel %vm134_vm4, %v829_v18, %v830_v15  ;;  %v308_v43 = vsel %vm134_vm4, %v287_v41, %v289_v33 }
 0x185   :  { %v833_v26 = vpop.permute.xlu1 %832  ;;  %v707_v28 = vpack.c.bf16 %v307_v20, %v305_v19 }
 0x186   :  { %v835_v29 = vunpack.i.h.bf16 %v833_v26  ;;  %v834_v31 = vunpack.i.l.bf16 %v833_v26 }
 0x187   :  { %708 = vmatprep.subr.bf16.mxu0 %v707_v28 }
 0x188   :  { %v304_v34 = vsel %vm134_vm4, %v834_v31, %v829_v18  ;;  %v306_v21 = vsel %vm134_vm4, %v835_v29, %v814_v9 }
 0x189   :  { %v291_v37 = vpop.permute.xlu1 %290  ;;  %v709_v39 = vpack.c.bf16 %v306_v21, %v304_v34 }
 0x18a   :  { %v309_v40 = vsel %vm134_vm4, %v289_v33, %v291_v37 }
 0x18b   :  { %710 = vmatpush1.bf16.msra.mxu0 %v709_v39 }
 0x18c   :  { %347 = vmatprep.subr.mxu0 %v309_v40 }
 0x18f   :  { %348 = vmatpush1.msra.mxu0 %v308_v43 }
 0x190   :  { %693 = vmatmul.mubr.msk.f32.vlgmr.msra.gmra.mrb[0].mxu0 %vm328_vm12, %v1120_v32 }
 0x19a   :  { %v233_v44 = vpop.permute.xlu1 %232 }
 0x263   :  { %v397_v46 = vpop.f32.mrb[0].mxu0 }
 0x264   :  { %v398_v48 = vadd.f32 %v397_v46, %v233_v44  ;;  %v399_v36 = vpop.f32.mrb[1].mxu0 }
 0x265   :  { %v400_v49 = vadd.f32 %v399_v36, %v233_v44 }
 0x266   :  { %v402_v51 = vmax.f32 %v398_v48, 0.0 }
 0x267   :  { %v403_v53 = vmax.f32 %v400_v49, 0.0 }
 0x268   :  { %v418_v56 = vmul.f32 %v402_v51, %v1008_v25  ;;  %v423_v57 = vmul.f32 %v402_v51, %v1020_v30  ;;  %v415_v58 = vmul.f32 %v402_v51, %v1013_v27  ;;  %v426_v59 = vmul.f32 %v402_v51, %v1036_v38 }
 0x269   :  { %v852_v60 = vpack.i.bf16 %v403_v53, %v402_v51  ;;  %v419_v22 = vmul.f32 %v403_v53, %v1004_v24  ;;  %v424_v32 = vmul.f32 %v403_v53, %v1027_v35  ;;  %v416_v61 = vmul.f32 %v403_v53, %v1002_v23  ;;  %v447_v35 = vpop.permute.xlu0 %446 }
 0x26a   :  { %v427_v63 = vmul.f32 %v403_v53, %v1041_v42  ;;  %v412_v30 = vmul.f32 %v402_v51, %v1078_v62  ;;  %v413_v38 = vmul.f32 %v403_v53, %v1060_v52  ;;  %v429_v23 = vmul.f32 %v402_v51, %v1049_v47  ;;  %v436_v42 = vpop.permute.xlu1 %435 }
 0x26b   :  { %853 = vrot.lane.b32.xlu1 %v852_v60, %s942_s24  ;;  %838 = vrot.lane.b32.xlu0 %v852_v60, %s935_s15  ;;  %v857_v25 = vpack.i.bf16 %v419_v22, %v418_v56  ;;  %v862_v0 = vpack.i.bf16 %v424_v32, %v423_v57  ;;  %v847_v27 = vpack.i.bf16 %v416_v61, %v415_v58 }
 0x26c   :  { %v867_v2 = vpack.i.bf16 %v427_v63, %v426_v59  ;;  %v872_v3 = vpack.i.bf16 %v413_v38, %v412_v30  ;;  %v430_v24 = vmul.f32 %v403_v53, %v1058_v50 }
 0x26d   :  { %v478_v52 = vpop.permute.xlu0 %477 }
 0x26f   :  { %843 = vrot.lane.b32.xlu0 %v852_v60, %s939_s22  ;;  %858 = vrot.lane.b32.xlu1 %v857_v25, %s940_s0 }
 0x273   :  { %863 = vrot.lane.b32.xlu1 %v862_v0, %s943_s25  ;;  %848 = vrot.lane.b32.xlu0 %v847_v27, %s941_s23  ;;  %v1208_v27 = vld [vmem:[%s1241_s1 + $0x8] sm:$0xff] }
 0x277   :  { %868 = vrot.lane.b32.xlu1 %v867_v2, %s944_s26  ;;  %488 = vrot.lane.b32.xlu0 %v1045_v45, %s944_s26  ;;  %v458_v45 = vpop.permute.xlu1 %457 }
 0x27b   :  { %506 = vrot.lane.b32.xlu1 %v429_v23, %s945_s27  ;;  %499 = vrot.lane.b32.xlu0 %v933_v1, %s942_s24 }
 0x27f   :  { %510 = vrot.lane.b32.xlu1 %v1066_v54, %s945_s27  ;;  %508 = vrot.lane.b32.xlu0 %v430_v24, %s945_s27 }
 0x283   :  { %873 = vrot.lane.b32.xlu0 %v872_v3, %s938_s17 }
 0x2dd   :  { %v854_v62 = vpop.permute.xlu1 %853  ;;  %v839_v47 = vpop.permute.xlu0 %838 }
 0x2de   :  { %v841_v4 = vunpack.i.h.bf16 %v839_v47  ;;  %v840_v5 = vunpack.i.l.bf16 %v839_v47  ;;  %v856_v40 = vunpack.i.h.bf16 %v854_v62  ;;  %v855_v41 = vunpack.i.l.bf16 %v854_v62 }
 0x2e0   :  { %v442_v6 = vsel %vm95_vm0, %v840_v5, %v841_v4  ;;  %v441_v1 = vsel %vm95_vm0, %v436_v42, %v840_v5  ;;  %v501_v56 = vsel %vm215_vm8, %v855_v41, %v856_v40 }
 0x2e1   :  { %v882_v50 = vpack.i.bf16 %v841_v4, %v442_v6  ;;  %v844_v7 = vpop.permute.xlu0 %843  ;;  %v859_v8 = vpop.permute.xlu1 %858  ;;  %v877_v54 = vpack.i.bf16 %v441_v1, %v1069_v55 }
 0x2e2   :  { %v846_v9 = vunpack.i.h.bf16 %v844_v7  ;;  %v845_v10 = vunpack.i.l.bf16 %v844_v7  ;;  %v861_v11 = vunpack.i.h.bf16 %v859_v8  ;;  %v860_v12 = vunpack.i.l.bf16 %v859_v8 }
 0x2e3   :  { %883 = vrot.lane.b32.xlu1 %v882_v50, %s938_s17  ;;  %878 = vrot.lane.b32.xlu0 %v877_v54, %s938_s17 }
 0x2e4   :  { %v469_v13 = vsel %vm51_vm5, %v845_v10, %v846_v9  ;;  %v464_v19 = vsel %vm174_vm6, %v860_v12, %v861_v11  ;;  %v463_v28 = vsel %vm174_vm6, %v458_v45, %v860_v12 }
 0x2e5   :  { %v887_v14 = vpack.i.bf16 %v846_v9, %v469_v13  ;;  %v864_v15 = vpop.permute.xlu1 %863  ;;  %v849_v18 = vpop.permute.xlu0 %848  ;;  %v902_v29 = vpack.i.bf16 %v861_v11, %v464_v19 }
 0x2e6   :  { %v851_v20 = vunpack.i.h.bf16 %v849_v18  ;;  %v850_v26 = vunpack.i.l.bf16 %v849_v18  ;;  %v866_v31 = vunpack.i.h.bf16 %v864_v15  ;;  %v865_v33 = vunpack.i.l.bf16 %v864_v15 }
 0x2e7   :  { %888 = vrot.lane.b32.xlu0 %v887_v14, %s938_s17 }
 0x2e8   :  { %v452_v55 = vsel %vm162_vm7, %v447_v35, %v850_v26  ;;  %v453_v37 = vsel %vm162_vm7, %v850_v26, %v851_v20  ;;  %v907_v43 = vpack.i.bf16 %v865_v33, %v845_v10  ;;  %v479_v48 = vsel %vm191_vm9, %v865_v33, %v866_v31 }
 0x2e9   :  { %v489_v34 = vpop.permute.xlu0 %488  ;;  %v892_v21 = vpack.i.bf16 %v463_v28, %v452_v55  ;;  %v869_v39 = vpop.permute.xlu1 %868  ;;  %v897_v44 = vpack.i.bf16 %v851_v20, %v453_v37  ;;  %v480_v53 = vsel %vm191_vm9, %v866_v31, %v478_v52 }
 0x2ea   :  { %v871_v36 = vunpack.i.h.bf16 %v869_v39  ;;  %v870_v49 = vunpack.i.l.bf16 %v869_v39  ;;  %v917_v58 = vpack.i.bf16 %v480_v53, %v479_v48 }
 0x2eb   :  { %893 = vrot.lane.b32.xlu1 %v892_v21, %s938_s17  ;;  %903 = vrot.lane.b32.xlu0 %v902_v29, %s938_s17 }
 0x2ec   :  { %v490_v59 = vsel %vm203_vm10, %v870_v49, %v871_v36  ;;  %v491_v60 = vsel %vm203_vm10, %v871_v36, %v489_v34  ;;  %v927_v25 = vpack.i.bf16 %v855_v41, %v870_v49 }
 0x2ed   :  { %v500_v46 = vpop.permute.xlu0 %499  ;;  %v922_v32 = vpack.i.bf16 %v491_v60, %v490_v59  ;;  %v507_v61 = vpop.permute.xlu1 %506 }
 0x2ee   :  { %v502_v51 = vsel %vm215_vm8, %v856_v40, %v500_v46 }
 0x2ef   :  { %898 = vrot.lane.b32.xlu1 %v897_v44, %s938_s17  ;;  %908 = vrot.lane.b32.xlu0 %v907_v43, %s938_s17  ;;  %v912_v57 = vpack.i.bf16 %v502_v51, %v501_v56 }
 0x2f1   :  { %v509_v22 = vpop.permute.xlu0 %508  ;;  %v511_v30 = vpop.permute.xlu1 %510 }
 0x2f2   :  { %v512_v63 = vsel %vm227_vm11, %v507_v61, %v509_v22  ;;  %v513_v0 = vsel %vm227_vm11, %v509_v22, %v511_v30 }
 0x2f3   :  { %918 = vrot.lane.b32.xlu1 %v917_v58, %s938_s17  ;;  %913 = vrot.lane.b32.xlu0 %v912_v57, %s938_s17 }
 0x2f5   :  { %v874_v2 = vpop.permute.xlu0 %873 }
 0x2f6   :  { %v876_v38 = vunpack.i.h.bf16 %v874_v2  ;;  %v875_v3 = vunpack.i.l.bf16 %v874_v2 }
 0x2f7   :  { %923 = vrot.lane.b32.xlu1 %v922_v32, %s938_s17  ;;  %572 = vrot.lane.b32.xlu0 %v512_v63, %s938_s17 }
 0x2f8   :  { %v577_v62 = vsel %vm134_vm4, %v875_v3, %v876_v38 }
 0x2fb   :  { %928 = vrot.lane.b32.xlu1 %v927_v25, %s938_s17  ;;  %570 = vrot.lane.b32.xlu0 %v507_v61, %s938_s17 }
 0x2ff   :  { %574 = vrot.lane.b32.xlu1 %v513_v0, %s938_s17 }
 0x303   :  { %516 = vperm.xlu1 %836, %v1208_v27  }
 0x355   :  { %v884_v23 = vpop.permute.xlu1 %883  ;;  %v879_v24 = vpop.permute.xlu0 %878 }
 0x356   :  { %v886_v35 = vunpack.i.h.bf16 %v884_v23  ;;  %v885_v42 = vunpack.i.l.bf16 %v884_v23  ;;  %v881_v52 = vunpack.i.h.bf16 %v879_v24  ;;  %v880_v45 = vunpack.i.l.bf16 %v879_v24 }
 0x358   :  { %v579_v47 = vsel %vm134_vm4, %v885_v42, %v886_v35  ;;  %v576_v4 = vsel %vm134_vm4, %v880_v45, %v875_v3  ;;  %v578_v5 = vsel %vm134_vm4, %v881_v52, %v885_v42 }
 0x359   :  { %v889_v6 = vpop.permute.xlu0 %888  ;;  %v711_v1 = vpack.c.bf16 %v579_v47, %v577_v62  ;;  %v713_v50 = vpack.c.bf16 %v578_v5, %v576_v4 }
 0x35a   :  { %v891_v18 = vunpack.i.h.bf16 %v889_v6  ;;  %v890_v19 = vunpack.i.l.bf16 %v889_v6 }
 0x35b   :  { %712 = vmatprep.subr.bf16.mxu1 %v711_v1 }
 0x35c   :  { %714 = vmatpush1.bf16.msra.mxu1 %v713_v50  ;;  %v585_v41 = vsel %vm134_vm4, %v890_v19, %v891_v18 }
 0x35d   :  { %v894_v7 = vpop.permute.xlu1 %893  ;;  %v904_v8 = vpop.permute.xlu0 %903 }
 0x35e   :  { %v896_v54 = vunpack.i.h.bf16 %v894_v7  ;;  %v906_v9 = vunpack.i.h.bf16 %v904_v8  ;;  %v905_v10 = vunpack.i.l.bf16 %v904_v8  ;;  %v895_v13 = vunpack.i.l.bf16 %v894_v7 }
 0x360   :  { %v583_v55 = vsel %vm134_vm4, %v905_v10, %v906_v9  ;;  %v582_v29 = vsel %vm134_vm4, %v896_v54, %v905_v10 }
 0x361   :  { %v899_v11 = vpop.permute.xlu1 %898  ;;  %v909_v12 = vpop.permute.xlu0 %908 }
 0x362   :  { %v901_v14 = vunpack.i.h.bf16 %v899_v11  ;;  %v900_v15 = vunpack.i.l.bf16 %v899_v11  ;;  %v910_v20 = vunpack.i.l.bf16 %v909_v12  ;;  %v911_v37 = vunpack.i.h.bf16 %v909_v12 }
 0x364   :  { %v581_v26 = vsel %vm134_vm4, %v900_v15, %v901_v14  ;;  %v580_v28 = vsel %vm134_vm4, %v895_v13, %v900_v15  ;;  %v584_v43 = vsel %vm134_vm4, %v910_v20, %v890_v19 }
 0x365   :  { %v919_v31 = vpop.permute.xlu1 %918  ;;  %v914_v33 = vpop.permute.xlu0 %913  ;;  %v715_v34 = vpack.c.bf16 %v583_v55, %v581_v26  ;;  %v717_v21 = vpack.c.bf16 %v582_v29, %v580_v28 }
 0x366   :  { %v921_v39 = vunpack.i.h.bf16 %v919_v31  ;;  %v920_v40 = vunpack.i.l.bf16 %v919_v31  ;;  %v916_v44 = vunpack.i.h.bf16 %v914_v33  ;;  %v915_v46 = vunpack.i.l.bf16 %v914_v33 }
 0x367   :  { %716 = vmatprep.subr.bf16.mxu1 %v715_v34 }
 0x368   :  { %718 = vmatpush1.bf16.msra.mxu1 %v717_v21  ;;  %v587_v48 = vsel %vm134_vm4, %v920_v40, %v921_v39  ;;  %v586_v36 = vsel %vm134_vm4, %v911_v37, %v920_v40  ;;  %v591_v59 = vsel %vm134_vm4, %v915_v46, %v916_v44 }
 0x369   :  { %v924_v49 = vpop.permute.xlu1 %923  ;;  %v719_v51 = vpack.c.bf16 %v587_v48, %v585_v41  ;;  %v721_v53 = vpack.c.bf16 %v586_v36, %v584_v43  ;;  %v573_v60 = vpop.permute.xlu0 %572 }
 0x36a   :  { %v926_v56 = vunpack.i.h.bf16 %v924_v49  ;;  %v925_v57 = vunpack.i.l.bf16 %v924_v49 }
 0x36b   :  { %720 = vmatprep.subr.bf16.mxu1 %v719_v51 }
 0x36c   :  { %722 = vmatpush1.bf16.msra.mxu1 %v721_v53  ;;  %v589_v58 = vsel %vm134_vm4, %v925_v57, %v926_v56 }
 0x36d   :  { %v929_v22 = vpop.permute.xlu1 %928  ;;  %v723_v32 = vpack.c.bf16 %v591_v59, %v589_v58  ;;  %v571_v3 = vpop.permute.xlu0 %570 }
 0x36e   :  { %v931_v61 = vunpack.i.h.bf16 %v929_v22  ;;  %v930_v63 = vunpack.i.l.bf16 %v929_v22  ;;  %v592_v23 = vsel %vm134_vm4, %v571_v3, %v573_v60 }
 0x36f   :  { %724 = vmatprep.subr.bf16.mxu1 %v723_v32 }
 0x370   :  { %v588_v25 = vsel %vm134_vm4, %v930_v63, %v925_v57  ;;  %v590_v30 = vsel %vm134_vm4, %v931_v61, %v915_v46 }
 0x371   :  { %v575_v0 = vpop.permute.xlu1 %574  ;;  %v725_v2 = vpack.c.bf16 %v590_v30, %v588_v25 }
 0x372   :  { %v593_v38 = vsel %vm134_vm4, %v573_v60, %v575_v0 }
 0x373   :  { %726 = vmatpush1.bf16.msra.mxu1 %v725_v2 }
 0x374   :  { %630 = vmatprep.subr.mxu1 %v593_v38 }
 0x377   :  { %631 = vmatpush1.msra.mxu1 %v592_v23 }
 0x378   :  { %694 = vmatmul.mubr.msk.f32.vlgmr.msra.gmra.mrb[0].mxu1 %vm328_vm12, %v1208_v27 }
 0x382   :  { %v517_v24 = vpop.permute.xlu1 %516 }
 0x44b   :  { %v680_v35 = vpop.f32.mrb[0].mxu1 }
 0x44c   :  { %v681_v42 = vadd.f32 %v680_v35, %v517_v24  ;;  %v682_v52 = vpop.f32.mrb[1].mxu1 }
 0x44d   :  { %v683_v45 = vadd.f32 %v682_v52, %v517_v24 }
 0x44e   :  { %v685_v62 = vadd.f32 %v681_v42, %v979_v16 }
 0x44f   :  { %v686_v47 = vadd.f32 %v683_v45, %v984_v17 }
 0x450   :  { %687 = vst [vmem:[%s1242_s3] sm:$0xff] %v685_v62 }
 0x451   :  { %688 = vst [vmem:[%s1242_s3 + $0x8] sm:$0xff] %v686_v47 }

</bundles_post_ra>
